<compile_context>
chip_gen: v7x
topology: tpu7x:2x2x1
jax: 0.10.0
libtpu: 0.0.40
codegen_flags: <defaults>
</compile_context>

<pallas_src>
import jax
import jax.numpy as jnp
import numpy as np
from jax.experimental import pallas as pl
from jax.experimental.pallas import tpu as pltpu


# ---------------------------------------------------------------------------
# Fused kernel: per grid step t — embedding gather + L GRU layers + Linear.
# Weights are VMEM-resident across all steps; hidden is carried in h_new_ref.
# ---------------------------------------------------------------------------
def decoder_fused_kernel(tok_ref, emb_ref, h0_ref,
                         w_i_ref, w_h_ref, b_all_ref,
                         fc_w_ref, fc_b_ref,
                         preds_ref, h_new_ref):
    L, B, H = h0_ref.shape
    in_max = w_i_ref.shape[1]
    wdt = w_i_ref.dtype                      # weight (MXU operand) dtype
    t = pl.program_id(0)

    # Seed the resident hidden-state carry from the h0 input on the first step.
    @pl.when(t == 0)
    def _():
        h_new_ref[...] = h0_ref[...]

    h_prev = h_new_ref[...]                  # (L, B, H) f32, previous-step hidden

    # ---- embedding gather: SMEM token ids + dynamic row slices (no one-hot) --
    rows = [emb_ref[pl.ds(tok_ref[b, t], 1), :] for b in range(B)]
    x = jnp.concatenate(rows, axis=0)        # (B, E) f32

    # ---- hoisted recurrent matmuls: only depend on prev-step hidden ----------
    gh = [jnp.dot(h_prev[l].astype(wdt), w_h_ref[l],
                  preferred_element_type=jnp.float32)        # (B, 3H) f32
          for l in range(L)]

    # ---- serial stacked-layer loop: one input matmul + gate VPU math/layer ---
    new_h = []
    for l in range(L):
        d = x.shape[1]
        x_in = x if d == in_max else jnp.pad(x, ((0, 0), (0, in_max - d)))
        gi = jnp.dot(x_in.astype(wdt), w_i_ref[l],
                     preferred_element_type=jnp.float32)     # (B, 3H) f32
        b = b_all_ref[l]                                     # (1, 4H) f32
        h = h_prev[l]                                        # (B, H) f32
        # Gate order (r, z, n); r/z biases pre-folded at pack time.
        rz = jax.nn.sigmoid(gi[:, :2 * H] + gh[l][:, :2 * H] + b[:, :2 * H])
        r = rz[:, :H]
        z = rz[:, H:]
        n = jnp.tanh(gi[:, 2 * H:] + b[:, 2 * H:3 * H]
                     + r * (gh[l][:, 2 * H:] + b[:, 3 * H:]))
        h_next = (1.0 - z) * n + z * h
        new_h.append(h_next)
        x = h_next                           # inter-layer dropout = identity (eval)

    # Single store of this step's new hidden (carry for step t+1, final output).
    h_new_ref[...] = jnp.stack(new_h, axis=0)

    # ---- final Linear into a lane-dense (B, Vp) tile -------------------------
    preds_ref[0] = (jnp.dot(x.astype(wdt), fc_w_ref[...],
                            preferred_element_type=jnp.float32)
                    + fc_b_ref[...])


# ---------------------------------------------------------------------------
# Wrappers
# ---------------------------------------------------------------------------
def decoder_rnn_steps(packed, tokens, hidden):
    """Run T fused decode steps (teacher-forced token ids).

    tokens: (B, T) int32; hidden: (L, B, H) f32.
    Returns preds (T, B, V) and the final hidden (L, B, H).
    Each step is exactly one DecoderRNN.forward() call.
    """
    B, T = tokens.shape
    L, _, H = hidden.shape
    V = packed["vocab"]
    Vp = packed["fc_w"].shape[1]
    VE, E = packed["embedding"].shape
    in_max = packed["w_i"].shape[1]

    preds_p, h_fin = pl.pallas_call(
        decoder_fused_kernel,
        grid=(T,),
        out_shape=(jax.ShapeDtypeStruct((T, B, Vp), jnp.float32),
                   jax.ShapeDtypeStruct((L, B, H), jnp.float32)),
        in_specs=[
            pl.BlockSpec(memory_space=pltpu.MemorySpace.SMEM),       # token ids
            pl.BlockSpec((VE, E), lambda t: (0, 0)),                 # embedding
            pl.BlockSpec((L, B, H), lambda t: (0, 0, 0)),            # h0
            pl.BlockSpec((L, in_max, 3 * H), lambda t: (0, 0, 0)),   # w_i
            pl.BlockSpec((L, H, 3 * H), lambda t: (0, 0, 0)),        # w_h
            pl.BlockSpec((L, 1, 4 * H), lambda t: (0, 0, 0)),        # biases
            pl.BlockSpec((H, Vp), lambda t: (0, 0)),                 # fc_w
            pl.BlockSpec((1, Vp), lambda t: (0, 0)),                 # fc_b
        ],
        out_specs=(
            pl.BlockSpec((1, B, Vp), lambda t: (t, 0, 0)),           # preds[t]
            pl.BlockSpec((L, B, H), lambda t: (0, 0, 0)),            # hidden carry
        ),
        input_output_aliases={2: 1},        # hidden input <-> new hidden output
        compiler_params=pltpu.CompilerParams(
            dimension_semantics=("arbitrary",)),
    )(tokens.astype(jnp.int32), packed["embedding"], hidden,
      packed["w_i"], packed["w_h"], packed["b_all"],
      packed["fc_w"], packed["fc_b"])

    return preds_p[:, :, :V], h_fin


def decoder_rnn_forward(packed, x, hidden):
    """Mirror of DecoderRNN.forward for rc_unit='gru', seq_len == 1."""
    preds, h_new = decoder_rnn_steps(packed, x.reshape(x.shape[0], 1), hidden)
    return preds[0], h_new


# ---------------------------------------------------------------------------
# One-time weight packing (gate concat, bias fold, lane padding for fc)
# ---------------------------------------------------------------------------
def pack_params(params, param_dtype=jnp.float32):
    V, E = params["embedding"].shape
    H = params["gru_layers"][0]["w_hr"].shape[0]
    in_max = max(E, H)
    Vp = ((V + 127) // 128) * 128

    w_i, w_h, b_all = [], [], []
    for l, p in enumerate(params["gru_layers"]):
        in_dim = E if l == 0 else H
        wi = jnp.concatenate([p["w_ir"], p["w_iz"], p["w_in"]], axis=1)  # (in_dim, 3H)
        wi = jnp.pad(wi, ((0, in_max - in_dim), (0, 0)))
        w_i.append(wi)
        w_h.append(jnp.concatenate([p["w_hr"], p["w_hz"], p["w_hn"]], axis=1))
        b_all.append(jnp.concatenate([p["b_ir"] + p["b_hr"],
                                      p["b_iz"] + p["b_hz"],
                                      p["b_in"], p["b_hn"]], axis=1))    # (1, 4H)

    return {
        # Embedding is gathered (not an MXU operand): keep f32 for exact rows.
        "embedding": params["embedding"],
        "w_i": jnp.stack(w_i, axis=0).astype(param_dtype),   # (L, in_max, 3H)
        "w_h": jnp.stack(w_h, axis=0).astype(param_dtype),   # (L, H, 3H)
        "b_all": jnp.stack(b_all, axis=0),                   # (L, 1, 4H) f32
        "fc_w": jnp.pad(params["fc_w"],
                        ((0, 0), (0, Vp - V))).astype(param_dtype),  # (H, Vp)
        "fc_b": jnp.pad(params["fc_b"], ((0, 0), (0, Vp - V))),      # (1, Vp) f32
        "vocab": V,
    }


# ---------------------------------------------------------------------------
# Pure-JAX reference (unpacked per-gate weights) for verification
# ---------------------------------------------------------------------------
def decoder_rnn_reference(params, x, hidden):
    embedded = jnp.take(params["embedding"], x, axis=0)
    layer_in = embedded[:, 0, :]
    new_hidden = []
    for li, p in enumerate(params["gru_layers"]):
        h = hidden[li]
        gi_r = layer_in @ p["w_ir"] + p["b_ir"]
        gi_z = layer_in @ p["w_iz"] + p["b_iz"]
        gi_n = layer_in @ p["w_in"] + p["b_in"]
        gh_r = h @ p["w_hr"] + p["b_hr"]
        gh_z = h @ p["w_hz"] + p["b_hz"]
        gh_n = h @ p["w_hn"] + p["b_hn"]
        r = jax.nn.sigmoid(gi_r + gh_r)
        z = jax.nn.sigmoid(gi_z + gh_z)
        n = jnp.tanh(gi_n + r * gh_n)
        h_new = (1.0 - z) * n + z * h
        new_hidden.append(h_new)
        layer_in = h_new
    preds = layer_in @ params["fc_w"] + params["fc_b"]
    return preds, jnp.stack(new_hidden, axis=0)


def decoder_rnn_reference_steps(params, tokens, hidden):
    h = hidden
    outs = []
    for t in range(tokens.shape[1]):
        p, h = decoder_rnn_reference(params, tokens[:, t:t + 1], h)
        outs.append(p)
    return jnp.stack(outs, axis=0), h


# ---------------------------------------------------------------------------
# Deterministic parameter construction (matches nn module shapes)
# ---------------------------------------------------------------------------
def init_params(key, vocab, embed, hidden, num_layers):
    scale = 1.0 / np.sqrt(hidden)
    keys = iter(jax.random.split(key, 4 + num_layers * 12))

    def u(shape):
        return jax.random.uniform(next(keys), shape, jnp.float32, -scale, scale)

    params = {
        "embedding": jax.random.normal(next(keys), (vocab, embed), jnp.float32),
        "fc_w": u((hidden, vocab)),        # nn.Linear(hidden, vocab).weight.T
        "fc_b": u((1, vocab)),
        "gru_layers": [],
    }
    for l in range(num_layers):
        in_dim = embed if l == 0 else hidden
        layer = {
            # weight_ih_l{k} / weight_hh_l{k}, gate order (r, z, n), transposed
            "w_ir": u((in_dim, hidden)), "w_iz": u((in_dim, hidden)), "w_in": u((in_dim, hidden)),
            "w_hr": u((hidden, hidden)), "w_hz": u((hidden, hidden)), "w_hn": u((hidden, hidden)),
            "b_ir": u((1, hidden)), "b_iz": u((1, hidden)), "b_in": u((1, hidden)),
            "b_hr": u((1, hidden)), "b_hz": u((1, hidden)), "b_hn": u((1, hidden)),
        }
        params["gru_layers"].append(layer)
    return params


if __name__ == "__main__":
    B = 2            # batch
    VOCAB = 64       # output_vocab_size
    EMBED = 32       # embed_size
    HIDDEN = 32      # hidden_size
    LAYERS = 2       # num_layers
    T = 4            # fused decode steps for the multi-step path

    key = jax.random.PRNGKey(0)
    k_param, k_tok, k_hid, k_seq = jax.random.split(key, 4)

    params = init_params(k_param, VOCAB, EMBED, HIDDEN, LAYERS)
    packed = pack_params(params)                              # f32 weights
    x = jax.random.randint(k_tok, (B, 1), 0, VOCAB, dtype=jnp.int32)
    hidden0 = jax.random.normal(k_hid, (LAYERS, B, HIDDEN), jnp.float32)

    # --- single-step forward (module semantics), strict f32 check ----------
    preds, new_hidden = decoder_rnn_forward(packed, x, hidden0)
    preds = jax.block_until_ready(preds)
    new_hidden = jax.block_until_ready(new_hidden)
    ref_preds, ref_hidden = decoder_rnn_reference(params, x, hidden0)
    np.testing.assert_allclose(np.asarray(preds), np.asarray(ref_preds),
                               rtol=1e-5, atol=1e-5)
    np.testing.assert_allclose(np.asarray(new_hidden), np.asarray(ref_hidden),
                               rtol=1e-5, atol=1e-5)
    assert preds.shape == (B, VOCAB)
    assert new_hidden.shape == (LAYERS, B, HIDDEN)

    # --- fused multi-step (T teacher-forced steps in one pallas_call) ------
    tokens = jax.random.randint(k_seq, (B, T), 0, VOCAB, dtype=jnp.int32)
    preds_seq, h_fin = decoder_rnn_steps(packed, tokens, hidden0)
    preds_seq = jax.block_until_ready(preds_seq)
    h_fin = jax.block_until_ready(h_fin)
    ref_seq, ref_hfin = decoder_rnn_reference_steps(params, tokens, hidden0)
    np.testing.assert_allclose(np.asarray(preds_seq), np.asarray(ref_seq),
                               rtol=1e-5, atol=1e-5)
    np.testing.assert_allclose(np.asarray(h_fin), np.asarray(ref_hfin),
                               rtol=1e-5, atol=1e-5)
    assert preds_seq.shape == (T, B, VOCAB)

    # --- bf16 weight storage (v6e/v7x DMA/MXU path), f32 gate math ---------
    packed_bf16 = pack_params(params, jnp.bfloat16)
    preds_bf, h_bf = decoder_rnn_steps(packed_bf16, tokens, hidden0)
    preds_bf = jax.block_until_ready(preds_bf)
    h_bf = jax.block_until_ready(h_bf)
    np.testing.assert_allclose(np.asarray(preds_bf), np.asarray(ref_seq),
                               rtol=1e-1, atol=1e-1)
    np.testing.assert_allclose(np.asarray(h_bf), np.asarray(ref_hfin),
                               rtol=1e-1, atol=1e-1)

    print("KERNEL_OK")
</pallas_src>

<mosaic_0001>
module attributes {stable_mosaic.version = 11 : i64} {
  func.func @decoder_fused_kernel(%arg0: i32, %arg1: memref<2x1xi32, #tpu.memory_space<smem>>, %arg2: memref<64x32xf32, #tpu.memory_space<vmem>>, %arg3: memref<2x2x32xf32, #tpu.memory_space<vmem>>, %arg4: memref<2x32x96xf32, #tpu.memory_space<vmem>>, %arg5: memref<2x32x96xf32, #tpu.memory_space<vmem>>, %arg6: memref<2x1x128xf32, #tpu.memory_space<vmem>>, %arg7: memref<32x128xf32, #tpu.memory_space<vmem>>, %arg8: memref<1x128xf32, #tpu.memory_space<vmem>>, %arg9: memref<1x2x128xf32, #tpu.memory_space<vmem>>, %arg10: memref<2x2x32xf32, #tpu.memory_space<vmem>>) attributes {dimension_semantics = [#tpu.dimension_semantics<arbitrary>], iteration_bounds = array<i64: 1>, scalar_prefetch = 0 : i64, scratch_operands = 0 : i64, tpu.core_type = #tpu.core_type<tc>, window_params = [{transform_indices = @transform_0, window_bounds = array<i64: 2, 1>}, {pipeline_mode = #tpu.pipeline_mode<synchronous>, transform_indices = @transform_1, window_bounds = array<i64: 64, 32>}, {pipeline_mode = #tpu.pipeline_mode<synchronous>, transform_indices = @transform_2, window_bounds = array<i64: 2, 2, 32>}, {pipeline_mode = #tpu.pipeline_mode<synchronous>, transform_indices = @transform_3, window_bounds = array<i64: 2, 32, 96>}, {pipeline_mode = #tpu.pipeline_mode<synchronous>, transform_indices = @transform_4, window_bounds = array<i64: 2, 32, 96>}, {pipeline_mode = #tpu.pipeline_mode<synchronous>, transform_indices = @transform_5, window_bounds = array<i64: 2, 1, 128>}, {pipeline_mode = #tpu.pipeline_mode<synchronous>, transform_indices = @transform_6, window_bounds = array<i64: 32, 128>}, {pipeline_mode = #tpu.pipeline_mode<synchronous>, transform_indices = @transform_7, window_bounds = array<i64: 1, 128>}, {transform_indices = @transform_8, window_bounds = array<i64: 1, 2, 128>}, {pipeline_mode = #tpu.pipeline_mode<synchronous>, transform_indices = @transform_9, window_bounds = array<i64: 2, 2, 32>}]} {
    %c0_i32 = arith.constant 0 : i32
    %0 = arith.cmpi eq, %arg0, %c0_i32 : i32
    %1 = arith.extui %0 : i1 to i32
    %c0_i32_0 = arith.constant 0 : i32
    %2 = arith.cmpi ne, %1, %c0_i32_0 : i32
    scf.if %2 {
      %c0_42 = arith.constant 0 : index
      %c0_43 = arith.constant 0 : index
      %c0_44 = arith.constant 0 : index
      %107 = vector.load %arg3[%c0_42, %c0_43, %c0_44] : memref<2x2x32xf32, #tpu.memory_space<vmem>>, vector<2x2x32xf32>
      %c0_45 = arith.constant 0 : index
      %c0_46 = arith.constant 0 : index
      %c0_47 = arith.constant 0 : index
      %108 = vector.load %arg10[%c0_45, %c0_46, %c0_47] : memref<2x2x32xf32, #tpu.memory_space<vmem>>, vector<2x2x32xf32>
      tpu.vector_store %arg10[%c0_45, %c0_46, %c0_47], %107 {strides = array<i32>} : memref<2x2x32xf32, #tpu.memory_space<vmem>>, vector<2x2x32xf32>,
    } else {
    }
    %c0 = arith.constant 0 : index
    %c0_1 = arith.constant 0 : index
    %c0_2 = arith.constant 0 : index
    %3 = vector.load %arg10[%c0, %c0_1, %c0_2] : memref<2x2x32xf32, #tpu.memory_space<vmem>>, vector<2x2x32xf32>
    %c0_3 = arith.constant 0 : index
    %4 = arith.index_cast %arg0 : i32 to index
    %5 = memref.load %arg1[%c0_3, %4] : memref<2x1xi32, #tpu.memory_space<smem>>
    %6 = arith.index_cast %5 : i32 to index
    %c0_4 = arith.constant 0 : index
    %7 = vector.load %arg2[%6, %c0_4] : memref<64x32xf32, #tpu.memory_space<vmem>>, vector<1x32xf32>
    %c1 = arith.constant 1 : index
    %8 = arith.index_cast %arg0 : i32 to index
    %9 = memref.load %arg1[%c1, %8] : memref<2x1xi32, #tpu.memory_space<smem>>
    %10 = arith.index_cast %9 : i32 to index
    %c0_5 = arith.constant 0 : index
    %11 = vector.load %arg2[%10, %c0_5] : memref<64x32xf32, #tpu.memory_space<vmem>>, vector<1x32xf32>
    %12 = tpu.concatenate %7, %11 in 0 : vector<1x32xf32>, vector<1x32xf32> -> vector<2x32xf32>
    %13 = vector.extract_strided_slice %3 {offsets = [0, 0, 0], sizes = [1, 2, 32], strides = [1, 1, 1]} : vector<2x2x32xf32> to vector<1x2x32xf32>
    %14 = vector.shape_cast %13 : vector<1x2x32xf32> to vector<2x32xf32>
    %c0_6 = arith.constant 0 : index
    %c0_7 = arith.constant 0 : index
    %c0_8 = arith.constant 0 : index
    %15 = vector.load %arg5[%c0_6, %c0_7, %c0_8] : memref<2x32x96xf32, #tpu.memory_space<vmem>>, vector<1x32x96xf32>
    %16 = vector.shape_cast %15 : vector<1x32x96xf32> to vector<32x96xf32>
    %cst = arith.constant dense<0.000000e+00> : vector<2x96xf32>
    %17 = tpu.matmul %14, %16, %cst {dimension_numbers = #tpu.dot_dimension_numbers<[1], [0], [0], [1], [0, 0, 1, 1], [], []>} : vector<2x32xf32>, vector<32x96xf32>, vector<2x96xf32> -> vector<2x96xf32>
    %18 = vector.extract_strided_slice %3 {offsets = [1, 0, 0], sizes = [1, 2, 32], strides = [1, 1, 1]} : vector<2x2x32xf32> to vector<1x2x32xf32>
    %19 = vector.shape_cast %18 : vector<1x2x32xf32> to vector<2x32xf32>
    %c1_9 = arith.constant 1 : index
    %c0_10 = arith.constant 0 : index
    %c0_11 = arith.constant 0 : index
    %20 = vector.load %arg5[%c1_9, %c0_10, %c0_11] : memref<2x32x96xf32, #tpu.memory_space<vmem>>, vector<1x32x96xf32>
    %21 = vector.shape_cast %20 : vector<1x32x96xf32> to vector<32x96xf32>
    %cst_12 = arith.constant dense<0.000000e+00> : vector<2x96xf32>
    %22 = tpu.matmul %19, %21, %cst_12 {dimension_numbers = #tpu.dot_dimension_numbers<[1], [0], [0], [1], [0, 0, 1, 1], [], []>} : vector<2x32xf32>, vector<32x96xf32>, vector<2x96xf32> -> vector<2x96xf32>
    %c0_13 = arith.constant 0 : index
    %c0_14 = arith.constant 0 : index
    %c0_15 = arith.constant 0 : index
    %23 = vector.load %arg4[%c0_13, %c0_14, %c0_15] : memref<2x32x96xf32, #tpu.memory_space<vmem>>, vector<1x32x96xf32>
    %24 = vector.shape_cast %23 : vector<1x32x96xf32> to vector<32x96xf32>
    %cst_16 = arith.constant dense<0.000000e+00> : vector<2x96xf32>
    %25 = tpu.matmul %12, %24, %cst_16 {dimension_numbers = #tpu.dot_dimension_numbers<[1], [0], [0], [1], [0, 0, 1, 1], [], []>} : vector<2x32xf32>, vector<32x96xf32>, vector<2x96xf32> -> vector<2x96xf32>
    %c0_17 = arith.constant 0 : index
    %c0_18 = arith.constant 0 : index
    %c0_19 = arith.constant 0 : index
    %26 = vector.load %arg6[%c0_17, %c0_18, %c0_19] : memref<2x1x128xf32, #tpu.memory_space<vmem>>, vector<1x1x128xf32>
    %27 = vector.shape_cast %26 : vector<1x1x128xf32> to vector<1x128xf32>
    %28 = vector.extract_strided_slice %3 {offsets = [0, 0, 0], sizes = [1, 2, 32], strides = [1, 1, 1]} : vector<2x2x32xf32> to vector<1x2x32xf32>
    %29 = vector.shape_cast %28 : vector<1x2x32xf32> to vector<2x32xf32>
    %30 = vector.extract_strided_slice %25 {offsets = [0, 0], sizes = [2, 64], strides = [1, 1]} : vector<2x96xf32> to vector<2x64xf32>
    %31 = vector.extract_strided_slice %17 {offsets = [0, 0], sizes = [2, 64], strides = [1, 1]} : vector<2x96xf32> to vector<2x64xf32>
    %32 = arith.addf %30, %31 : vector<2x64xf32>
    %33 = vector.extract_strided_slice %27 {offsets = [0, 0], sizes = [1, 64], strides = [1, 1]} : vector<1x128xf32> to vector<1x64xf32>
    %34 = vector.broadcast %33 : vector<1x64xf32> to vector<2x64xf32>
    %35 = arith.addf %32, %34 : vector<2x64xf32>
    %36 = arith.negf %35 : vector<2x64xf32>
    %37 = math.exp %36 : vector<2x64xf32>
    %cst_20 = arith.constant 1.000000e+00 : f32
    %38 = vector.broadcast %cst_20 : f32 to vector<2x64xf32>
    %39 = arith.addf %38, %37 : vector<2x64xf32>
    %40 = arith.divf %38, %39 : vector<2x64xf32>
    %41 = vector.extract_strided_slice %40 {offsets = [0, 0], sizes = [2, 32], strides = [1, 1]} : vector<2x64xf32> to vector<2x32xf32>
    %42 = vector.extract_strided_slice %40 {offsets = [0, 32], sizes = [2, 32], strides = [1, 1]} : vector<2x64xf32> to vector<2x32xf32>
    %43 = vector.extract_strided_slice %25 {offsets = [0, 64], sizes = [2, 32], strides = [1, 1]} : vector<2x96xf32> to vector<2x32xf32>
    %44 = vector.extract_strided_slice %27 {offsets = [0, 64], sizes = [1, 32], strides = [1, 1]} : vector<1x128xf32> to vector<1x32xf32>
    %45 = vector.broadcast %44 : vector<1x32xf32> to vector<2x32xf32>
    %46 = arith.addf %43, %45 : vector<2x32xf32>
    %47 = vector.extract_strided_slice %17 {offsets = [0, 64], sizes = [2, 32], strides = [1, 1]} : vector<2x96xf32> to vector<2x32xf32>
    %48 = vector.extract_strided_slice %27 {offsets = [0, 96], sizes = [1, 32], strides = [1, 1]} : vector<1x128xf32> to vector<1x32xf32>
    %49 = vector.broadcast %48 : vector<1x32xf32> to vector<2x32xf32>
    %50 = arith.addf %47, %49 : vector<2x32xf32>
    %51 = arith.mulf %41, %50 : vector<2x32xf32>
    %52 = arith.addf %46, %51 : vector<2x32xf32>
    %53 = math.tanh %52 : vector<2x32xf32>
    %cst_21 = arith.constant 1.000000e+00 : f32
    %54 = vector.broadcast %cst_21 : f32 to vector<2x32xf32>
    %55 = arith.subf %54, %42 : vector<2x32xf32>
    %56 = arith.mulf %55, %53 : vector<2x32xf32>
    %57 = arith.mulf %42, %29 : vector<2x32xf32>
    %58 = arith.addf %56, %57 : vector<2x32xf32>
    %c1_22 = arith.constant 1 : index
    %c0_23 = arith.constant 0 : index
    %c0_24 = arith.constant 0 : index
    %59 = vector.load %arg4[%c1_22, %c0_23, %c0_24] : memref<2x32x96xf32, #tpu.memory_space<vmem>>, vector<1x32x96xf32>
    %60 = vector.shape_cast %59 : vector<1x32x96xf32> to vector<32x96xf32>
    %cst_25 = arith.constant dense<0.000000e+00> : vector<2x96xf32>
    %61 = tpu.matmul %58, %60, %cst_25 {dimension_numbers = #tpu.dot_dimension_numbers<[1], [0], [0], [1], [0, 0, 1, 1], [], []>} : vector<2x32xf32>, vector<32x96xf32>, vector<2x96xf32> -> vector<2x96xf32>
    %c1_26 = arith.constant 1 : index
    %c0_27 = arith.constant 0 : index
    %c0_28 = arith.constant 0 : index
    %62 = vector.load %arg6[%c1_26, %c0_27, %c0_28] : memref<2x1x128xf32, #tpu.memory_space<vmem>>, vector<1x1x128xf32>
    %63 = vector.shape_cast %62 : vector<1x1x128xf32> to vector<1x128xf32>
    %64 = vector.extract_strided_slice %3 {offsets = [1, 0, 0], sizes = [1, 2, 32], strides = [1, 1, 1]} : vector<2x2x32xf32> to vector<1x2x32xf32>
    %65 = vector.shape_cast %64 : vector<1x2x32xf32> to vector<2x32xf32>
    %66 = vector.extract_strided_slice %61 {offsets = [0, 0], sizes = [2, 64], strides = [1, 1]} : vector<2x96xf32> to vector<2x64xf32>
    %67 = vector.extract_strided_slice %22 {offsets = [0, 0], sizes = [2, 64], strides = [1, 1]} : vector<2x96xf32> to vector<2x64xf32>
    %68 = arith.addf %66, %67 : vector<2x64xf32>
    %69 = vector.extract_strided_slice %63 {offsets = [0, 0], sizes = [1, 64], strides = [1, 1]} : vector<1x128xf32> to vector<1x64xf32>
    %70 = vector.broadcast %69 : vector<1x64xf32> to vector<2x64xf32>
    %71 = arith.addf %68, %70 : vector<2x64xf32>
    %72 = arith.negf %71 : vector<2x64xf32>
    %73 = math.exp %72 : vector<2x64xf32>
    %cst_29 = arith.constant 1.000000e+00 : f32
    %74 = vector.broadcast %cst_29 : f32 to vector<2x64xf32>
    %75 = arith.addf %74, %73 : vector<2x64xf32>
    %76 = arith.divf %74, %75 : vector<2x64xf32>
    %77 = vector.extract_strided_slice %76 {offsets = [0, 0], sizes = [2, 32], strides = [1, 1]} : vector<2x64xf32> to vector<2x32xf32>
    %78 = vector.extract_strided_slice %76 {offsets = [0, 32], sizes = [2, 32], strides = [1, 1]} : vector<2x64xf32> to vector<2x32xf32>
    %79 = vector.extract_strided_slice %61 {offsets = [0, 64], sizes = [2, 32], strides = [1, 1]} : vector<2x96xf32> to vector<2x32xf32>
    %80 = vector.extract_strided_slice %63 {offsets = [0, 64], sizes = [1, 32], strides = [1, 1]} : vector<1x128xf32> to vector<1x32xf32>
    %81 = vector.broadcast %80 : vector<1x32xf32> to vector<2x32xf32>
    %82 = arith.addf %79, %81 : vector<2x32xf32>
    %83 = vector.extract_strided_slice %22 {offsets = [0, 64], sizes = [2, 32], strides = [1, 1]} : vector<2x96xf32> to vector<2x32xf32>
    %84 = vector.extract_strided_slice %63 {offsets = [0, 96], sizes = [1, 32], strides = [1, 1]} : vector<1x128xf32> to vector<1x32xf32>
    %85 = vector.broadcast %84 : vector<1x32xf32> to vector<2x32xf32>
    %86 = arith.addf %83, %85 : vector<2x32xf32>
    %87 = arith.mulf %77, %86 : vector<2x32xf32>
    %88 = arith.addf %82, %87 : vector<2x32xf32>
    %89 = math.tanh %88 : vector<2x32xf32>
    %cst_30 = arith.constant 1.000000e+00 : f32
    %90 = vector.broadcast %cst_30 : f32 to vector<2x32xf32>
    %91 = arith.subf %90, %78 : vector<2x32xf32>
    %92 = arith.mulf %91, %89 : vector<2x32xf32>
    %93 = arith.mulf %78, %65 : vector<2x32xf32>
    %94 = arith.addf %92, %93 : vector<2x32xf32>
    %95 = vector.shape_cast %58 : vector<2x32xf32> to vector<1x2x32xf32>
    %96 = vector.shape_cast %94 : vector<2x32xf32> to vector<1x2x32xf32>
    %97 = tpu.concatenate %95, %96 in 0 : vector<1x2x32xf32>, vector<1x2x32xf32> -> vector<2x2x32xf32>
    %c0_31 = arith.constant 0 : index
    %c0_32 = arith.constant 0 : index
    %c0_33 = arith.constant 0 : index
    %98 = vector.load %arg10[%c0_31, %c0_32, %c0_33] : memref<2x2x32xf32, #tpu.memory_space<vmem>>, vector<2x2x32xf32>
    tpu.vector_store %arg10[%c0_31, %c0_32, %c0_33], %97 {strides = array<i32>} : memref<2x2x32xf32, #tpu.memory_space<vmem>>, vector<2x2x32xf32>,
    %c0_34 = arith.constant 0 : index
    %c0_35 = arith.constant 0 : index
    %99 = vector.load %arg7[%c0_34, %c0_35] : memref<32x128xf32, #tpu.memory_space<vmem>>, vector<32x128xf32>
    %cst_36 = arith.constant dense<0.000000e+00> : vector<2x128xf32>
    %100 = tpu.matmul %94, %99, %cst_36 {dimension_numbers = #tpu.dot_dimension_numbers<[1], [0], [0], [1], [0, 0, 1, 1], [], []>} : vector<2x32xf32>, vector<32x128xf32>, vector<2x128xf32> -> vector<2x128xf32>
    %c0_37 = arith.constant 0 : index
    %c0_38 = arith.constant 0 : index
    %101 = vector.load %arg8[%c0_37, %c0_38] : memref<1x128xf32, #tpu.memory_space<vmem>>, vector<1x128xf32>
    %102 = vector.broadcast %101 : vector<1x128xf32> to vector<2x128xf32>
    %103 = arith.addf %100, %102 : vector<2x128xf32>
    %c0_39 = arith.constant 0 : index
    %c0_40 = arith.constant 0 : index
    %c0_41 = arith.constant 0 : index
    %104 = vector.load %arg9[%c0_39, %c0_40, %c0_41] : memref<1x2x128xf32, #tpu.memory_space<vmem>>, vector<1x2x128xf32>
    %105 = vector.shape_cast %104 : vector<1x2x128xf32> to vector<2x128xf32>
    %106 = vector.shape_cast %103 : vector<2x128xf32> to vector<1x2x128xf32>
    tpu.vector_store %arg9[%c0_39, %c0_40, %c0_41], %106 {strides = array<i32>} : memref<1x2x128xf32, #tpu.memory_space<vmem>>, vector<1x2x128xf32>,
    return
  }
  func.func @transform_0(%arg0: i32) -> (i32, i32) {
    %c0_i32 = arith.constant 0 : i32
    %c0_i32_0 = arith.constant 0 : i32
    %c0_i32_1 = arith.constant 0 : i32
    return %c0_i32, %c0_i32_0 : i32, i32
  }
  func.func @transform_1(%arg0: i32) -> (i32, i32) {
    %c0_i32 = arith.constant 0 : i32
    %c0_i32_0 = arith.constant 0 : i32
    %c0_i32_1 = arith.constant 0 : i32
    return %c0_i32, %c0_i32_0 : i32, i32
  }
  func.func @transform_2(%arg0: i32) -> (i32, i32, i32) {
    %c0_i32 = arith.constant 0 : i32
    %c0_i32_0 = arith.constant 0 : i32
    %c0_i32_1 = arith.constant 0 : i32
    %c0_i32_2 = arith.constant 0 : i32
    return %c0_i32, %c0_i32_0, %c0_i32_1 : i32, i32, i32
  }
  func.func @transform_3(%arg0: i32) -> (i32, i32, i32) {
    %c0_i32 = arith.constant 0 : i32
    %c0_i32_0 = arith.constant 0 : i32
    %c0_i32_1 = arith.constant 0 : i32
    %c0_i32_2 = arith.constant 0 : i32
    return %c0_i32, %c0_i32_0, %c0_i32_1 : i32, i32, i32
  }
  func.func @transform_4(%arg0: i32) -> (i32, i32, i32) {
    %c0_i32 = arith.constant 0 : i32
    %c0_i32_0 = arith.constant 0 : i32
    %c0_i32_1 = arith.constant 0 : i32
    %c0_i32_2 = arith.constant 0 : i32
    return %c0_i32, %c0_i32_0, %c0_i32_1 : i32, i32, i32
  }
  func.func @transform_5(%arg0: i32) -> (i32, i32, i32) {
    %c0_i32 = arith.constant 0 : i32
    %c0_i32_0 = arith.constant 0 : i32
    %c0_i32_1 = arith.constant 0 : i32
    %c0_i32_2 = arith.constant 0 : i32
    return %c0_i32, %c0_i32_0, %c0_i32_1 : i32, i32, i32
  }
  func.func @transform_6(%arg0: i32) -> (i32, i32) {
    %c0_i32 = arith.constant 0 : i32
    %c0_i32_0 = arith.constant 0 : i32
    %c0_i32_1 = arith.constant 0 : i32
    return %c0_i32, %c0_i32_0 : i32, i32
  }
  func.func @transform_7(%arg0: i32) -> (i32, i32) {
    %c0_i32 = arith.constant 0 : i32
    %c0_i32_0 = arith.constant 0 : i32
    %c0_i32_1 = arith.constant 0 : i32
    return %c0_i32, %c0_i32_0 : i32, i32
  }
  func.func @transform_8(%arg0: i32) -> (i32, i32, i32) {
    %c0_i32 = arith.constant 0 : i32
    %c0_i32_0 = arith.constant 0 : i32
    %c0_i32_1 = arith.constant 0 : i32
    return %arg0, %c0_i32, %c0_i32_0 : i32, i32, i32
  }
  func.func @transform_9(%arg0: i32) -> (i32, i32, i32) {
    %c0_i32 = arith.constant 0 : i32
    %c0_i32_0 = arith.constant 0 : i32
    %c0_i32_1 = arith.constant 0 : i32
    %c0_i32_2 = arith.constant 0 : i32
    return %c0_i32, %c0_i32_0, %c0_i32_1 : i32, i32, i32
  }
}

</mosaic_0001>

<bundles_post_ra>
// kernel: tpu_custom_call.1
= control target key start
LH: loop header
LB: loop body
LE: loop exit
PB: predicated region body
PF: predicated region fallthrough
CT: control target
= control target key end

     0   :  { %15 = vsyncpa [#allocation5], 0  ;;  %s1143_s0 = inlined_call_operand.vmem [shape: s32[2,1], index: 0, kind: input, shape index: {}]   ;;  %s1144_s1 = inlined_call_operand.vmem [shape: f32[64,32], index: 1, kind: input, shape index: {}]   ;;  %s1145_s2 = inlined_call_operand.hbm [shape: f32[2,2,32], index: 2, kind: input, shape index: {}, may-alias: {2,9}]   ;;  %s1146_s3 = inlined_call_operand.vmem [shape: f32[2,32,96], index: 3, kind: input, shape index: {}]   ;;  %s1147_s4 = inlined_call_operand.hbm [shape: f32[2,32,96], index: 4, kind: input, shape index: {}]   ;;  %s1148_s5 = inlined_call_operand.vmem [shape: f32[2,1,128], index: 5, kind: input, shape index: {}]   ;;  %s1149_s6 = inlined_call_operand.vmem [shape: f32[32,128], index: 6, kind: input, shape index: {}]   ;;  %s1150_s7 = inlined_call_operand.hbm [shape: f32[1,128], index: 7, kind: input, shape index: {}]   ;;  %s1151_s8 = inlined_call_operand.hbm [shape: f32[1,2,128], index: 8, kind: output, shape index: {0}]   ;;  %s1152_s9 = inlined_call_operand.hbm [shape: f32[2,2,32], index: 9, kind: output, shape index: {1}, may-alias: {2,9}]  }
   0x1   :  { %16 = vsyncpa [#allocation3], 0 }
   0x2   :  { %17 = vsyncpa [#allocation8], 0 }
   0x3   :  { %18 = vsyncpa [#allocation4], 0 }
   0x4   :  { %19 = vsyncpa [#allocation12], 0  ;;  %s920_s30 = smov [#allocation7]   ;;  %s26_s13 = sshll.u32 %s1143_s0, 4  ;;  %s27_s13 = int_to_ptr.vmem [resolvable:$true] %s26_s13 }
   0x5   :  { %s51_s10 = sshll.u32 %s920_s30, 4  ;;  %s788_s16 = scalar_lea.hbm %s1147_s4, 1024  ;;  %s52_s10 = int_to_ptr.vmem [resolvable:$true] %s51_s10 }
   0x6   :  { %p789_p0 = scmp.ne.s32.totalorder %s1147_s4, %s788_s16  ;;  %p792_p1 = scmp.lt.u32.totalorder %s788_s16, %s1147_s4 }
   0x8   :  { %p794_p2 = pnand %p792_p1, %p789_p0 }
   0xa   :  { %797 = shalt.err (!%p794_p2)
}
   0xb   :  { %s798_s21 = scalar_lea.vmem %s52_s10, 1024  ;;  %p803_p4 = scmp.lt.s32.totalorder %s52_s10, %s52_s10 }
   0xc   :  { %p799_p3 = scmp.ne.s32.totalorder %s52_s10, %s798_s21  ;;  %p804_p5 = scmp.lt.s32.totalorder %s798_s21, %s798_s21 }
   0xe   :  { %p805_p6 = por %p804_p5, %p803_p4 }
  0x10   :  { %p806_p7 = pnand %p805_p6, %p799_p3 }
  0x12   :  { %809 = shalt.err (!%p806_p7)
}
  0x13   :  { %s921_s0 = smov 128   ;;  %s922_s22 = smov 8  }
  0x14   :  { %57 = dma.hbm_to_vmem [thread:$0]  %s1147_s4, 1024, %s52_s10, [#allocation8], %s921_s0, %s921_s0, %s922_s22  }
  0x15   :  { %s810_s25 = scalar_lea.vmem %s27_s13, 32  ;;  %p815_p9 = scmp.lt.s32.totalorder %s27_s13, %s27_s13 }
  0x16   :  { %p811_p8 = scmp.ne.s32.totalorder %s27_s13, %s810_s25  ;;  %p816_p10 = scmp.lt.s32.totalorder %s810_s25, %s810_s25 }
  0x18   :  { %p817_p11 = por %p816_p10, %p815_p9 }
  0x1a   :  { %p818_p12 = pnand %p817_p11, %p811_p8 }
  0x1c   :  { %821 = shalt.err (!%p818_p12)
}
  0x1d   :  { %s923_s26 = smov [#allocation2]   ;;  %s924_s27 = smov [#allocation6]  }
  0x1e   :  { %29 = dma.vmem_to_smem %s27_s13, 32, %s923_s26, [#allocation5]  }
  0x1f   :  { %s37_s28 = sshll.u32 %s924_s27, 4  ;;  %s822_s11 = scalar_lea.hbm %s1145_s2, 64  ;;  %s38_s28 = int_to_ptr.vmem [resolvable:$true] %s37_s28 }
  0x20   :  { %p823_p13 = scmp.ne.s32.totalorder %s1145_s2, %s822_s11  ;;  %p826_p0 = scmp.lt.u32.totalorder %s822_s11, %s1145_s2 }
  0x22   :  { %p828_p1 = pnand %p826_p0, %p823_p13 }
  0x24   :  { %831 = shalt.err (!%p828_p1)
}
  0x25   :  { %s832_s15 = scalar_lea.vmem %s38_s28, 64  ;;  %p837_p3 = scmp.lt.s32.totalorder %s38_s28, %s38_s28 }
  0x26   :  { %p833_p2 = scmp.ne.s32.totalorder %s38_s28, %s832_s15  ;;  %p838_p4 = scmp.lt.s32.totalorder %s832_s15, %s832_s15 }
  0x28   :  { %p839_p5 = por %p838_p4, %p837_p3 }
  0x2a   :  { %p840_p6 = pnand %p839_p5, %p833_p2 }
  0x2c   :  { %843 = shalt.err (!%p840_p6)
}
  0x2d   :  { %s925_s13 = smov 32   ;;  %s926_s16 = smov 2  }
  0x2e   :  { %43 = dma.hbm_to_vmem [thread:$0]  %s1145_s2, 64, %s38_s28, [#allocation3], %s925_s13, %s925_s13, %s926_s16  }
  0x2f   :  { %s927_s19 = smov [#allocation9]   ;;  %s844_s22 = scalar_lea.hbm %s1150_s7, 16 }
  0x30   :  { %s68_s20 = sshll.u32 %s927_s19, 4  ;;  %p845_p7 = scmp.ne.s32.totalorder %s1150_s7, %s844_s22  ;;  %s69_s20 = int_to_ptr.vmem [resolvable:$true] %s68_s20 }
  0x31   :  { %p848_p8 = scmp.lt.u32.totalorder %s844_s22, %s1150_s7 }
  0x33   :  { %p850_p9 = pnand %p848_p8, %p845_p7 }
  0x35   :  { %853 = shalt.err (!%p850_p9)
}
  0x36   :  { %s854_s27 = scalar_lea.vmem %s69_s20, 16  ;;  %s858_s2 = scalar_lea.vmem %s69_s20, 32 }
  0x37   :  { %p855_p10 = scmp.ne.s32.totalorder %s69_s20, %s854_s27  ;;  %p859_p11 = scmp.lt.s32.totalorder %s69_s20, %s69_s20 }
  0x38   :  { %p860_p12 = scmp.lt.s32.totalorder %s858_s2, %s854_s27 }
  0x3a   :  { %p861_p13 = por %p860_p12, %p859_p11 }
  0x3c   :  { %p862_p0 = pnand %p861_p13, %p855_p10 }
  0x3e   :  { %865 = shalt.err (!%p862_p0)
}
  0x3f   :  { %71 = dma.hbm_to_vmem [thread:$0]  %s1150_s7, 16, %s69_s20, [#allocation8]  }
  0x40   :  { %910 = dma.done.wait [#allocation5], 32  }
  0x41   :  { %911 = vsyncadd [#allocation5], 4294967264 }
  0x42   :  { %912 = dma.done.wait [#allocation3], 64  }
  0x43   :  { %913 = vsyncadd [#allocation3], 4294967232 }
  0x44   :  { %914 = dma.done.wait [#allocation8], 1040  }
  0x45   :  { %915 = vsyncadd [#allocation8], 4294966256 }
  0x46   :  { %84 = sfence }
  0x47   :  { %v110_v0 = vld [vmem:[#allocation7] sm:$0xff]  ;;  %v111_v1 = vld [vmem:[#allocation7 + $0x8] sm:$0xff]  ;;  %v112_v2 = vld [vmem:[#allocation7 + $0x10] sm:$0xff]  ;;  %v928_v3 = vmov 0.0|0.0   ;;  %vm929_vm0 = vmmov 0   ;;  %v930_v6 = vmov 0.0  }
  0x48   :  { %731 = vmatprep.subr.bf16.mxu0 %v928_v3  ;;  %v732_v4 = vpack.c.bf16 %v111_v1, %v110_v0  ;;  %v113_v5 = vld [vmem:[#allocation7 + $0x18] sm:$0xff]  ;;  %684 = vmatprep.mubr.msk.f32.mxu0 %vm929_vm0, %v930_v6  ;;  %vm91_vm1 = vcmask 254976   ;;  %s96_s7 = sld [smem:[#allocation2]]  ;;  %v267_v11 = vld [vmem:[%s1146_s3 + $0x8] sm:$0xff]  ;;  %s931_s17 = smov 96   ;;  %vm114_vm2 = vcmask 261120  }
  0x49   :  { %v89_v7 = vld [vmem:[#allocation6] sm:$0x3]  ;;  %737 = vmatprep.subr.bf16.mxu1 %v928_v3  ;;  %695 = vmatprep.mubr.msk.f32.mxu1 %vm929_vm0, %v930_v6  ;;  %v735_v8 = vpack.c.bf16 %v113_v5, %v112_v2  ;;  %s635_s30 = sld [smem:[#allocation2 + $0x80]]  ;;  %v268_v13 = vld [vmem:[%s1146_s3 + $0x10] sm:$0xff]  ;;  %v269_v14 = vld [vmem:[%s1146_s3 + $0x18] sm:$0xff]  ;;  %vm108_vm3 = vcmask 1040384  }
  0x4a   :  { %92 = vst.msk [vmem:[#allocation11] sm:$0x3] %vm91_vm1, %v89_v7  ;;  %733 = vmatpush3.bf16.msra.mxu0 %v732_v4  ;;  %v639_v9 = vld [vmem:[%s1148_s5] ss:$0 sm:$0xff]  ;;  %v747_v17 = vpack.c.bf16 %v269_v14, %v268_v13  ;;  %v189_v38 = vld [vmem:[#allocation7 + $0x20] sm:$0xff]  ;;  %v190_v39 = vld [vmem:[#allocation7 + $0x28] sm:$0xff] }
  0x4b   :  { %734 = vmatprep.subr.bf16.mxu0 %v928_v3  ;;  %v266_v10 = vld [vmem:[%s1146_s3] sm:$0xff]  ;;  %359 = vrot.lane.b32.xlu0 %v639_v9, %s931_s17  ;;  %v191_v40 = vld [vmem:[#allocation7 + $0x30] sm:$0xff]  ;;  %v738_v41 = vpack.c.bf16 %v190_v39, %v189_v38  ;;  %v642_v46 = vld [vmem:[%s1146_s3 + $0x28] sm:$0xff] }
  0x4c   :  { %v744_v12 = vpack.c.bf16 %v267_v11, %v266_v10  ;;  %v192_v42 = vld [vmem:[#allocation7 + $0x38] sm:$0xff]  ;;  %v643_v49 = vld [vmem:[%s1146_s3 + $0x30] sm:$0xff] }
  0x4d   :  { %v90_v43 = vld [vmem:[#allocation6 + $0x2] sm:$0x3]  ;;  %739 = vmatpush3.bf16.msra.mxu1 %v738_v41  ;;  %v741_v44 = vpack.c.bf16 %v192_v42, %v191_v40  ;;  %v644_v50 = vld [vmem:[%s1146_s3 + $0x38] sm:$0xff]  ;;  %v647_v53 = vld [vmem:[%s1148_s5 + $0x1] ss:$0 sm:$0xff] }
  0x4e   :  { %736 = vmatpush3.bf16.msra.mxu0 %v735_v8  ;;  %s97_s23 = scalar_lea.vmem %s1144_s1, %s96_s7  ;;  %93 = vst.msk [vmem:[#allocation11 + $0x2] sm:$0x3] %vm91_vm1, %v90_v43  ;;  %740 = vmatprep.subr.bf16.mxu1 %v928_v3  ;;  %v641_v45 = vld [vmem:[%s1146_s3 + $0x20] sm:$0xff]  ;;  %v753_v52 = vpack.c.bf16 %v644_v50, %v643_v49 }
  0x4f   :  { %743 = vmatprep.subr.bf16.mxu0 %v928_v3  ;;  %s103_s26 = scalar_lea.vmem %s1144_s1, %s635_s30  ;;  %v98_v19 = vld [vmem:[%s97_s23] sm:$0x1]  ;;  %s932_s1 = smov 64   ;;  %v750_v47 = vpack.c.bf16 %v642_v46, %v641_v45 }
  0x50   :  { %v104_v16 = vld [vmem:[%s103_s26] sm:$0x1] }
  0x51   :  { %v94_v15 = vld [vmem:[#allocation11] sm:$0x3]  ;;  %v106_v18 = vrot.slane %v104_v16, 7  ;;  %742 = vmatpush3.bf16.msra.mxu1 %v741_v44 }
  0x52   :  { %685 = vmatmul.mubr.msk.f32.vlgmr.msra.gmra.mrb[0].mxu0 %vm114_vm2, %v94_v15  ;;  %749 = vmatprep.subr.bf16.mxu1 %v928_v3  ;;  %v517_v16 = vld [vmem:[%s1149_s6 + $0x8] sm:$0xff] }
  0x53   :  { %745 = vmatpush3.bf16.msra.mxu0 %v744_v12  ;;  %706 = vmatprep.mubr.msk.f32.mxu0 %vm929_vm0, %v930_v6  ;;  %v109_v20 = vsel %vm108_vm3, %v98_v19, %v106_v18  ;;  %v519_v19 = vld [vmem:[%s1149_s6 + $0x18] sm:$0xff] }
  0x54   :  { %746 = vmatprep.subr.bf16.mxu0 %v928_v3 }
  0x55   :  { %v95_v51 = vld [vmem:[#allocation11 + $0x2] sm:$0x3] }
  0x56   :  { %696 = vmatmul.mubr.msk.f32.vlgmr.msra.gmra.mrb[0].mxu1 %vm114_vm2, %v95_v51 }
  0x57   :  { %748 = vmatpush3.bf16.msra.mxu0 %v747_v17  ;;  %751 = vmatpush3.bf16.msra.mxu1 %v750_v47  ;;  %v518_v17 = vld [vmem:[%s1149_s6 + $0x10] sm:$0xff] }
  0x58   :  { %755 = vmatprep.subr.bf16.mxu0 %v928_v3  ;;  %717 = vmatprep.mubr.msk.f32.mxu1 %vm929_vm0, %v930_v6 }
  0x59   :  { %752 = vmatprep.subr.bf16.mxu1 %v928_v3 }
  0x5a   :  { %707 = vmatmul.mubr.msk.f32.vlgmr.msra.gmra.mrb[2].mxu0 %vm114_vm2, %v109_v20  ;;  %v759_v20 = vpack.c.bf16 %v519_v19, %v518_v17 }
  0x5b   :  { %728 = vmatprep.mubr.msk.f32.mxu0 %vm929_vm0, %v930_v6  ;;  %754 = vmatpush3.bf16.msra.mxu1 %v753_v52 }
  0xbd   :  { %v360_v21 = vpop.permute.xlu0 %359 }
 0x125   :  { %v184_v22 = vpop.f32.mrb[0].mxu0 }
 0x126   :  { %v362_v23 = vadd.f32 %v360_v21, %v184_v22  ;;  %v686_v24 = vpop.f32.mrb[1].mxu0 }
 0x128   :  { %364 = vrot.lane.b32.xlu0 %v362_v23, %s932_s1 }
 0x129   :  { %v262_v60 = vpop.f32.mrb[0].mxu1 }
 0x12a   :  { %v697_v61 = vpop.f32.mrb[1].mxu1 }
 0x12c   :  { %380 = vrot.lane.b32.xlu0 %v94_v15, %s925_s13  ;;  %v516_v15 = vld [vmem:[%s1149_s6] sm:$0xff]  ;;  %s933_s6 = smov [#allocation11]  }
 0x12d   :  { %v339_v25 = vpop.f32.mrb[2].mxu0  ;;  %v756_v18 = vpack.c.bf16 %v517_v16, %v516_v15  ;;  %s615_s0 = sshll.u32 %s933_s6, 4  ;;  %s616_s0 = int_to_ptr.vmem [resolvable:$true] %s615_s0 }
 0x12e   :  { %v344_v26 = vadd.f32 %v339_v25, %v184_v22  ;;  %v708_v27 = vpop.f32.mrb[3].mxu0  ;;  %v358_v35 = vadd.f32 %v639_v9, %v339_v25  ;;  %s866_s22 = scalar_lea.vmem %s616_s0, 64  ;;  %p871_p2 = scmp.lt.s32.totalorder %s616_s0, %s616_s0 }
 0x12f   :  { %757 = vmatpush3.bf16.msra.mxu0 %v756_v18  ;;  %p867_p1 = scmp.ne.s32.totalorder %s616_s0, %s866_s22  ;;  %p872_p3 = scmp.lt.s32.totalorder %s866_s22, %s866_s22 }
 0x130   :  { %v351_v28 = vadd.f32 %v639_v9, %v344_v26  ;;  %482 = vrot.lane.b32.xlu0 %v647_v53, %s931_s17  ;;  %758 = vmatprep.subr.bf16.mxu0 %v928_v3 }
 0x131   :  { %p873_p4 = por %p872_p3, %p871_p2 }
 0x132   :  { %v640_v29 = vmul.f32 -1.442695, %v351_v28 }
 0x133   :  { %760 = vmatpush3.bf16.msra.mxu0 %v759_v20  ;;  %p874_p5 = pnand %p873_p4, %p867_p1 }
 0x134   :  { %776 = vpow2.f32 %v640_v29 }
 0x13e   :  { %v777_v30 = vpop.eup %776 }
 0x13f   :  { %v355_v31 = vadd.f32 1.0, %v777_v30 }
 0x141   :  { %778 = vrcp.f32 %v355_v31 }
 0x14b   :  { %v779_v32 = vpop.eup %778 }
 0x14c   :  { %v374_v55 = vsub.f32 1.0, %v779_v32 }
 0x19a   :  { %v365_v33 = vpop.permute.xlu0 %364 }
 0x19b   :  { %v367_v34 = vmul.f32 %v779_v32, %v365_v33 }
 0x19d   :  { %369 = vrot.lane.b32.xlu1 %v367_v34, %s932_s1 }
 0x19e   :  { %v381_v54 = vpop.permute.xlu0 %380 }
 0x19f   :  { %v383_v57 = vmul.f32 %v779_v32, %v381_v54 }
 0x1a2   :  { %v483_v62 = vpop.permute.xlu0 %482 }
 0x1a3   :  { %v485_v63 = vadd.f32 %v483_v62, %v262_v60 }
 0x20f   :  { %v370_v36 = vpop.permute.xlu1 %369 }
 0x210   :  { %v372_v37 = vadd.f32 %v370_v36, %v358_v35 }
 0x212   :  { %780 = vtanh.f32 %v372_v37 }
 0x21c   :  { %v781_v48 = vpop.eup %780 }
 0x21d   :  { %376 = vrot.lane.b32.xlu1 %v781_v48, %s931_s17 }
 0x28f   :  { %v377_v56 = vpop.permute.xlu1 %376 }
 0x290   :  { %v379_v58 = vmul.f32 %v377_v56, %v374_v55 }
 0x292   :  { %v384_v59 = vadd.f32 %v383_v57, %v379_v58 }
 0x294   :  { %391 = vrot.lane.b32.xlu1 %v384_v59, %s931_s17 }
 0x298   :  { %487 = vrot.lane.b32.xlu1 %v485_v63, %s932_s1 }
 0x306   :  { %v392_v0 = vpop.permute.xlu1 %391 }
 0x307   :  { %514 = vst.msk [vmem:[#allocation11] sm:$0x3] %vm91_vm1, %v392_v0  ;;  %718 = vmatmul.mubr.msk.f32.vlgmr.msra.gmra.mrb[2].mxu1 %vm114_vm2, %v392_v0 }
 0x30a   :  { %v488_v9 = vpop.permute.xlu1 %487 }
 0x3da   :  { %v461_v1 = vpop.f32.mrb[2].mxu1 }
 0x3db   :  { %v467_v2 = vadd.f32 %v461_v1, %v262_v60  ;;  %v719_v4 = vpop.f32.mrb[3].mxu1  ;;  %v481_v12 = vadd.f32 %v647_v53, %v461_v1 }
 0x3dd   :  { %v474_v5 = vadd.f32 %v647_v53, %v467_v2 }
 0x3df   :  { %v648_v6 = vmul.f32 -1.442695, %v474_v5 }
 0x3e1   :  { %782 = vpow2.f32 %v648_v6 }
 0x3eb   :  { %v783_v7 = vpop.eup %782 }
 0x3ec   :  { %v478_v8 = vadd.f32 1.0, %v783_v7 }
 0x3ee   :  { %784 = vrcp.f32 %v478_v8 }
 0x3f8   :  { %v785_v10 = vpop.eup %784 }
 0x3f9   :  { %v490_v11 = vmul.f32 %v785_v10, %v488_v9  ;;  %v497_v23 = vsub.f32 1.0, %v785_v10 }
 0x3fb   :  { %492 = vrot.lane.b32.xlu0 %v490_v11, %s932_s1 }
 0x3ff   :  { %503 = vrot.lane.b32.xlu0 %v95_v51, %s925_s13 }
 0x46d   :  { %v493_v13 = vpop.permute.xlu0 %492 }
 0x46e   :  { %v495_v14 = vadd.f32 %v493_v13, %v481_v12 }
 0x470   :  { %786 = vtanh.f32 %v495_v14 }
 0x471   :  { %v504_v22 = vpop.permute.xlu0 %503 }
 0x472   :  { %v506_v25 = vmul.f32 %v785_v10, %v504_v22 }
 0x47a   :  { %v787_v21 = vpop.eup %786 }
 0x47b   :  { %499 = vrot.lane.b32.xlu1 %v787_v21, %s931_s17 }
 0x4ed   :  { %v500_v24 = vpop.permute.xlu1 %499 }
 0x4ee   :  { %v502_v26 = vmul.f32 %v500_v24, %v497_v23 }
 0x4f0   :  { %v507_v27 = vadd.f32 %v506_v25, %v502_v26 }
 0x4f2   :  { %509 = vrot.lane.b32.xlu1 %v507_v27, %s931_s17 }
 0x564   :  { %v510_v28 = vpop.permute.xlu1 %509 }
 0x565   :  { %515 = vst.msk [vmem:[#allocation11 + $0x2] sm:$0x3] %vm91_vm1, %v510_v28  ;;  %729 = vmatmul.mubr.msk.f32.vlgmr.msra.gmra.mrb[4].mxu0 %vm114_vm2, %v510_v28 }
 0x566   :  { %877 = shalt.err (!%p874_p5)
}
 0x567   :  { %s878_s25 = scalar_lea.hbm %s1152_s9, 64 }
 0x568   :  { %p879_p6 = scmp.ne.s32.totalorder %s1152_s9, %s878_s25  ;;  %p882_p7 = scmp.lt.u32.totalorder %s878_s25, %s1152_s9 }
 0x56a   :  { %p884_p8 = pnand %p882_p7, %p879_p6 }
 0x56c   :  { %887 = shalt.err (!%p884_p8)
}
 0x56d   :  { %621 = dma.vmem_to_hbm [thread:$0]  %s616_s0, 64, %s1152_s9, [#allocation12], %s925_s13, %s925_s13, %s926_s16   ;;  %v649_v3 = vld [vmem:[#allocation9] ss:$0 sm:$0xff] }
 0x56e   :  { %s934_s29 = smov [#allocation10]  }
 0x56f   :  { %s606_s7 = sshll.u32 %s934_s29, 4  ;;  %s607_s7 = int_to_ptr.vmem [resolvable:$true] %s606_s7 }
 0x570   :  { %s888_s30 = scalar_lea.vmem %s607_s7, 32  ;;  %p893_p10 = scmp.lt.s32.totalorder %s607_s7, %s607_s7 }
 0x571   :  { %p889_p9 = scmp.ne.s32.totalorder %s607_s7, %s888_s30  ;;  %p894_p11 = scmp.lt.s32.totalorder %s888_s30, %s888_s30 }
 0x573   :  { %p895_p12 = por %p894_p11, %p893_p10 }
 0x575   :  { %p896_p13 = pnand %p895_p12, %p889_p9 }
 0x638   :  { %v595_v29 = vpop.f32.mrb[4].mxu0 }
 0x639   :  { %v596_v30 = vadd.f32 %v649_v3, %v595_v29  ;;  %v730_v31 = vpop.f32.mrb[5].mxu0 }
 0x63b   :  { %599 = vst [vmem:[#allocation10] sm:$0x3] %v596_v30 }
 0x63c   :  { %899 = shalt.err (!%p896_p13)
}
 0x63d   :  { %s900_s14 = scalar_lea.hbm %s1151_s8, 32 }
 0x63e   :  { %p901_p0 = scmp.ne.s32.totalorder %s1151_s8, %s900_s14  ;;  %p904_p1 = scmp.lt.u32.totalorder %s900_s14, %s1151_s8 }
 0x640   :  { %p906_p2 = pnand %p904_p1, %p901_p0 }
 0x642   :  { %909 = shalt.err (!%p906_p2)
}
 0x643   :  { %609 = dma.vmem_to_hbm [thread:$0]  %s607_s7, 32, %s1151_s8, [#allocation4]  }
 0x644   :  { %916 = dma.done.wait [#allocation4], 32  }
 0x645   :  { %917 = vsyncadd [#allocation4], 4294967264 }
 0x646   :  { %918 = dma.done.wait [#allocation12], 64  }
 0x647   :  { %919 = vsyncadd [#allocation12], 4294967232 }
 0x648   :  { %628 = vsyncpa [#allocation3], 1 }
 0x649   :  { %629 = vsyncpa [#allocation8], 1 }
 0x64a   :  { %630 = vsyncpa [#allocation4], 1 }
 0x64b   :  { %631 = vsyncpa [#allocation12], 1 }
 0x64c   :  { %632 = vsyncpa [#allocation5], 1 }

</bundles_post_ra>
